<compile_context>
chip_gen: v7x
topology: tpu7x:2x2x1
jax: 0.10.0
libtpu: 0.0.40
codegen_flags: <defaults>
</compile_context>

<pallas_src>
import functools

import jax
import jax.numpy as jnp
from jax import lax
from jax.experimental import pallas as pl
from jax.experimental.pallas import tpu as pltpu

_LANES = 128


def _cdiv(a, b):
    return -(-a // b)


def _round_up(a, b):
    return _cdiv(a, b) * b


def _vmem_budget():
    """Generation-aware (working-set budget, vmem_limit_bytes)."""
    cap = None
    try:
        info = pltpu.get_tpu_info()
        cap = getattr(info, "vmem_capacity_bytes", None)
    except Exception:
        cap = None
    if cap is None:
        cap = 64 * 1024 * 1024  # conservative (v7x-sized) fallback
    if cap >= 96 * 1024 * 1024:                 # v5e / v6e: 128 MiB physical VMEM
        return 48 * 1024 * 1024, 96 * 1024 * 1024
    return 24 * 1024 * 1024, 40 * 1024 * 1024   # v7x: 64 MiB per TensorCore


def _choose_tile_rows(rows, num_classes, num_logits, itemsize, budget,
                      max_tile_rows=None):
    """Pick pixel-tile height (rows of 128 pixels). Returns (tile_rows, n_tiles).

    tile_rows is always a multiple of 8 and <= rows; n_tiles = cdiv(rows, tile).
    Prefers exact divisors of `rows` (no ragged last block, no padding).
    """
    # Double-buffered logits blocks + target block, per row of 128 pixels.
    per_row = 2 * (num_logits * num_classes * _LANES * itemsize + _LANES * 4)
    cap = int(budget // per_row)
    cap = max(8, min(cap, 1024))
    if max_tile_rows is not None:
        cap = min(cap, max_tile_rows)
    cap = max(8, (cap // 8) * 8)

    if rows <= cap:
        if rows % 8 == 0:
            return rows, 1                       # single exact tile
        tile = _round_up(_cdiv(rows, 2), 8)      # two balanced tiles, ragged last
        return tile, _cdiv(rows, tile)

    # rows > cap: largest multiple-of-8 divisor of rows that fits.
    best_div = 0
    for d in range(cap, 7, -8):
        if rows % d == 0:
            best_div = d
            break
    if best_div >= max(8, cap // 2):
        return best_div, rows // best_div

    # No good divisor: balanced ragged tiling (masked last tile).
    n_min = _cdiv(rows, cap)
    tile = min(_round_up(_cdiv(rows, n_min), 8), cap)
    return tile, _cdiv(rows, tile)


def _choose_chunk_rows(tile_rows, num_logits):
    """Row sub-chunk for the in-kernel compute so intermediates fit in vregs."""
    target = 32 if num_logits == 1 else 16
    if tile_rows <= target:
        return tile_rows
    best = 8                                     # tile_rows is a multiple of 8 here
    for c in range(8, target + 1, 8):
        if tile_rows % c == 0:
            best = c
    return best


def _choose_outer_split(n_batch, n_tiles):
    """Extra 'parallel' split of the pixel-tile axis (v7x megacore balance)."""
    if n_batch >= 4 or n_tiles <= 1:
        return 1
    best = 1
    for p in range(2, min(n_tiles, 8) + 1):
        if n_tiles % p == 0:
            best = p
            if n_batch * p >= 4:
                break
    return best


def _ce_kernel(*refs, num_logits, num_classes, tile_rows, chunk_rows, p_inner,
               n_tiles, hw, needs_mask):
    """Fused cross-entropy partial-sum kernel.

    refs = (logit_ref_0, ..., logit_ref_{L-1}, tgt_ref, out_ref)
      logit_ref_k: (1, C, tile_rows, 128) logits block (input dtype)
      tgt_ref:     (1, tile_rows, 128)    int32 class indices
      out_ref:     (1, 1, 128)            f32 per-(batch, outer-split) partials
    """
    logit_refs = refs[:num_logits]
    tgt_ref = refs[num_logits]
    out_ref = refs[num_logits + 1]

    pi = pl.program_id(2)                         # reduction (pixel-tile) axis
    j_global = pl.program_id(1) * p_inner + pi    # global pixel-tile index
    num_chunks = tile_rows // chunk_rows
    align_hint = chunk_rows & -chunk_rows         # largest pow2 dividing chunk_rows

    @pl.when(pi == 0)
    def _init():
        out_ref[...] = jnp.zeros_like(out_ref)

    def chunk_loss(ci, lane_acc, masked):
        r0 = ci * chunk_rows
        if not isinstance(r0, int):
            r0 = pl.multiple_of(r0, align_hint)
        rows_sl = pl.ds(r0, chunk_rows)
        tgt = tgt_ref[0, rows_sl, :]

        # Pass 1: per-head running max over classes, in the input dtype
        # (exact; avoids C casts/pixel for bf16 inputs on bf16-VPU chips).
        maxes = []
        for lref in logit_refs:
            m = lref[0, 0, rows_sl, :]
            for c in range(1, num_classes):
                m = jnp.maximum(m, lref[0, c, rows_sl, :])
            maxes.append(m.astype(jnp.float32))

        # Pass 2: classes outer / heads inner so each (tgt == c) mask is
        # computed once, not once per head.
        sums = [jnp.zeros((chunk_rows, _LANES), jnp.float32)
                for _ in range(num_logits)]
        picked = jnp.zeros((chunk_rows, _LANES), jnp.float32)
        for c in range(num_classes):
            mask_c = tgt == c
            if num_logits == 1:
                xc = logit_refs[0][0, c, rows_sl, :].astype(jnp.float32)
                sums[0] = sums[0] + jnp.exp(xc - maxes[0])
                picked = picked + jnp.where(mask_c, xc, 0.0)
            else:
                xsum = jnp.zeros((chunk_rows, _LANES), jnp.float32)
                for h, lref in enumerate(logit_refs):
                    xc = lref[0, c, rows_sl, :].astype(jnp.float32)
                    sums[h] = sums[h] + jnp.exp(xc - maxes[h])
                    xsum = xsum + xc
                picked = picked + jnp.where(mask_c, xsum, 0.0)

        total = -picked
        for h in range(num_logits):
            total = total + maxes[h] + jnp.log(sums[h])

        if masked:
            # Select (not multiply): ragged-block garbage rows may be inf/NaN
            # after exp/log; the select discards them safely.
            row_i = lax.broadcasted_iota(jnp.int32, (chunk_rows, _LANES), 0)
            lane_i = lax.broadcasted_iota(jnp.int32, (chunk_rows, _LANES), 1)
            pix = (j_global * tile_rows + r0 + row_i) * _LANES + lane_i
            total = jnp.where(pix < hw, total, 0.0)

        # Per-chunk sublane reduce (XLU is otherwise idle in this kernel).
        return lane_acc + jnp.sum(total, axis=0, keepdims=True)

    def tile_loss(masked):
        zero = jnp.zeros((1, _LANES), jnp.float32)
        if num_chunks == 1:
            acc = chunk_loss(0, zero, masked)
        else:
            acc = lax.fori_loop(0, num_chunks,
                                functools.partial(chunk_loss, masked=masked),
                                zero)
        out_ref[...] += acc[None]

    if not needs_mask:
        tile_loss(False)
    elif n_tiles == 1:
        tile_loss(True)           # only one tile and it contains padded pixels
    else:
        # Only the globally-last tile can contain padded / ragged pixels.
        is_padded_tile = (j_global + 1) * (tile_rows * _LANES) > hw
        pl.when(is_padded_tile)(lambda: tile_loss(True))
        pl.when(jnp.logical_not(is_padded_tile))(lambda: tile_loss(False))


def _cross_entropy_sum_pallas(logits_list, target, max_tile_rows=None):
    """Per-(batch, outer-split) lane partial sums of cross-entropy, summed over
    the given logits tensors.  Returns (N * P_outer, 1, 128) float32 partials."""
    num_logits = len(logits_list)
    N, C, H, W = logits_list[0].shape
    hw = H * W
    itemsize = jnp.dtype(logits_list[0].dtype).itemsize

    rows = max(_cdiv(hw, _LANES), 8)   # pixel rows of 128 lanes, at least one tile
    hw_pad = rows * _LANES             # wrapper pads only if hw % 128 != 0 or tiny

    budget, vmem_limit = _vmem_budget()
    tile_rows, n_tiles = _choose_tile_rows(rows, C, num_logits, itemsize,
                                           budget, max_tile_rows)
    chunk_rows = _choose_chunk_rows(tile_rows, num_logits)
    p_outer = _choose_outer_split(N, n_tiles)
    p_inner = n_tiles // p_outer
    needs_mask = (n_tiles * tile_rows * _LANES) != hw

    def prep_logits(x):
        x = x.reshape(N, C, hw)                  # free, contiguous reshape
        if hw_pad != hw:
            # Rare (H*W not a multiple of 128, or < 1024 pixels): one pad copy.
            x = jnp.pad(x, ((0, 0), (0, 0), (0, hw_pad - hw)))
        return x.reshape(N, C, rows, _LANES)

    logits_prepped = [prep_logits(x) for x in logits_list]
    tgt = target.reshape(N, hw).astype(jnp.int32)
    if hw_pad != hw:
        tgt = jnp.pad(tgt, ((0, 0), (0, hw_pad - hw)))
    tgt = tgt.reshape(N, rows, _LANES)

    kernel = functools.partial(
        _ce_kernel, num_logits=num_logits, num_classes=C, tile_rows=tile_rows,
        chunk_rows=chunk_rows, p_inner=p_inner, n_tiles=n_tiles, hw=hw,
        needs_mask=needs_mask)

    logits_spec = pl.BlockSpec((1, C, tile_rows, _LANES),
                               lambda n, po, pi: (n, 0, po * p_inner + pi, 0))
    tgt_spec = pl.BlockSpec((1, tile_rows, _LANES),
                            lambda n, po, pi: (n, po * p_inner + pi, 0))
    out_spec = pl.BlockSpec((1, 1, _LANES),
                            lambda n, po, pi: (n * p_outer + po, 0, 0))

    partials = pl.pallas_call(
        kernel,
        out_shape=jax.ShapeDtypeStruct((N * p_outer, 1, _LANES), jnp.float32),
        grid_spec=pltpu.PrefetchScalarGridSpec(
            num_scalar_prefetch=0,
            grid=(N, p_outer, p_inner),
            in_specs=[logits_spec] * num_logits + [tgt_spec],
            out_specs=out_spec,
        ),
        compiler_params=pltpu.CompilerParams(
            # (batch, outer pixel split) are independent -> megacore-shardable
            # on v7x; the inner pixel-tile axis carries the accumulation.
            dimension_semantics=("parallel", "parallel", "arbitrary"),
            vmem_limit_bytes=vmem_limit,
        ),
    )(*logits_prepped, tgt)
    return partials


def cross_entropy_pallas(pred, target, max_tile_rows=None):
    """pred: (N, C, H, W) logits; target: (N, H, W) int class indices.
    Returns scalar mean cross-entropy (matches nn.CrossEntropyLoss default)."""
    # TODO(synk): ignore_index is not supported (the module uses the default
    # CrossEntropyLoss, so every pixel counts).
    N, C, H, W = pred.shape
    partials = _cross_entropy_sum_pallas([pred], target, max_tile_rows)
    return jnp.sum(partials) / jnp.float32(N * H * W)


def bisinet_loss(pred, target, features_1=None, features_2=None, training=False):
    """Mirrors BiSiNetLoss.forward."""
    if training:
        if (features_1.shape == pred.shape) and (features_2.shape == pred.shape):
            # Fused: one pallas_call reads the target once and computes all
            # three losses' contributions per pixel tile.
            N, C, H, W = pred.shape
            partials = _cross_entropy_sum_pallas([pred, features_1, features_2],
                                                 target)
            return jnp.sum(partials) / jnp.float32(3 * N * H * W)
        # Mismatched aux-head shapes: fall back to separate launches.
        return (cross_entropy_pallas(pred, target)
                + cross_entropy_pallas(features_1, target)
                + cross_entropy_pallas(features_2, target)) / 3.0
    return cross_entropy_pallas(pred, target)


def _ce_reference(pred, target):
    # Pure-JAX reference (same math as torch CE with mean reduction).
    N, C, H, W = pred.shape
    logits = jnp.transpose(pred, (0, 2, 3, 1)).reshape(-1, C).astype(jnp.float32)
    tgt = target.reshape(-1).astype(jnp.int32)
    lse = jax.nn.logsumexp(logits, axis=-1)
    picked = jnp.take_along_axis(logits, tgt[:, None], axis=-1)[:, 0]
    return jnp.mean(lse - picked)


if __name__ == "__main__":
    key = jax.random.PRNGKey(0)
    k1, k2, k3, k4, k5, k6, k7, k8 = jax.random.split(key, 8)

    # --- Base shapes implied by the module (segmentation logits + aux heads).
    N, C, H, W = 2, 4, 16, 16
    pred = jax.random.normal(k1, (N, C, H, W), dtype=jnp.float32)
    features_1 = jax.random.normal(k2, (N, C, H, W), dtype=jnp.float32)
    features_2 = jax.random.normal(k3, (N, C, H, W), dtype=jnp.float32)
    target = jax.random.randint(k4, (N, H, W), 0, C, dtype=jnp.int32)

    loss_eval = jax.block_until_ready(bisinet_loss(pred, target, training=False))
    loss_train = jax.block_until_ready(
        bisinet_loss(pred, target, features_1, features_2, training=True))

    ref_eval = _ce_reference(pred, target)
    ref_train = (_ce_reference(pred, target) + _ce_reference(features_1, target)
                 + _ce_reference(features_2, target)) / 3.0
    assert jnp.allclose(loss_eval, ref_eval, atol=1e-5, rtol=1e-5), (loss_eval, ref_eval)
    assert jnp.allclose(loss_train, ref_train, atol=1e-5, rtol=1e-5), (loss_train, ref_train)

    # --- Exercise multi-chunk fori_loop, multi-tile + outer split + multi-step
    #     reduction, and the ragged-last-tile masked path (small shapes, the
    #     tile cap is forced down to trigger tiling).
    N2, C2, H2, W2 = 2, 5, 48, 128           # hw=6144 -> 48 pixel rows
    pred2 = jax.random.normal(k5, (N2, C2, H2, W2), dtype=jnp.float32)
    target2 = jax.random.randint(k6, (N2, H2, W2), 0, C2, dtype=jnp.int32)
    ref2 = _ce_reference(pred2, target2)
    out_a = jax.block_until_ready(cross_entropy_pallas(pred2, target2))                   # 1 tile, 2 chunks
    out_b = jax.block_until_ready(cross_entropy_pallas(pred2, target2, max_tile_rows=8))  # 6 tiles, outer split
    assert jnp.allclose(out_a, ref2, atol=1e-5, rtol=1e-5), (out_a, ref2)
    assert jnp.allclose(out_b, ref2, atol=1e-5, rtol=1e-5), (out_b, ref2)

    N3, C3, H3, W3 = 1, 3, 88, 128            # 88 rows, no nice divisor under cap
    pred3 = jax.random.normal(k7, (N3, C3, H3, W3), dtype=jnp.float32)
    target3 = jax.random.randint(k8, (N3, H3, W3), 0, C3, dtype=jnp.int32)
    ref3 = _ce_reference(pred3, target3)
    out_c = jax.block_until_ready(cross_entropy_pallas(pred3, target3, max_tile_rows=32))
    assert jnp.allclose(out_c, ref3, atol=1e-5, rtol=1e-5), (out_c, ref3)

    # --- H*W not a multiple of 128 -> wrapper pad + in-kernel mask path.
    N4, C4, H4, W4 = 2, 3, 20, 20
    pred4 = jax.random.normal(k1, (N4, C4, H4, W4), dtype=jnp.float32)
    target4 = jax.random.randint(k2, (N4, H4, W4), 0, C4, dtype=jnp.int32)
    ref4 = _ce_reference(pred4, target4)
    out_d = jax.block_until_ready(cross_entropy_pallas(pred4, target4))
    assert jnp.allclose(out_d, ref4, atol=1e-5, rtol=1e-5), (out_d, ref4)

    print("KERNEL_OK")
</pallas_src>

<mosaic_0001>
module attributes {stable_mosaic.version = 11 : i64} {
  func.func @_ce_kernel(%arg0: i32, %arg1: i32, %arg2: i32, %arg3: memref<1x4x8x128xf32, #tpu.memory_space<vmem>>, %arg4: memref<1x8x128xi32, #tpu.memory_space<vmem>>, %arg5: memref<1x1x128xf32, #tpu.memory_space<vmem>>) attributes {dimension_semantics = [#tpu.dimension_semantics<parallel>, #tpu.dimension_semantics<parallel>, #tpu.dimension_semantics<arbitrary>], iteration_bounds = array<i64: 2, 1, 1>, scalar_prefetch = 0 : i64, scratch_operands = 0 : i64, tpu.core_type = #tpu.core_type<tc>, window_params = [{transform_indices = @transform_0, window_bounds = array<i64: 1, 4, 8, 128>}, {transform_indices = @transform_1, window_bounds = array<i64: 1, 8, 128>}, {transform_indices = @transform_2, window_bounds = array<i64: 1, 1, 128>}]} {
    %c1_i32 = arith.constant 1 : i32
    %0 = arith.muli %arg1, %c1_i32 : i32
    %1 = arith.addi %0, %arg2 : i32
    %c0_i32 = arith.constant 0 : i32
    %2 = arith.cmpi eq, %arg2, %c0_i32 : i32
    %3 = arith.extui %2 : i1 to i32
    %c0_i32_0 = arith.constant 0 : i32
    %4 = arith.cmpi ne, %3, %c0_i32_0 : i32
    scf.if %4 {
      %cst_50 = arith.constant 0.000000e+00 : f32
      %86 = vector.broadcast %cst_50 : f32 to vector<1x1x128xf32>
      %c0_51 = arith.constant 0 : index
      %c0_52 = arith.constant 0 : index
      %c0_53 = arith.constant 0 : index
      %87 = vector.load %arg5[%c0_51, %c0_52, %c0_53] : memref<1x1x128xf32, #tpu.memory_space<vmem>>, vector<1x1x128xf32>
      tpu.vector_store %arg5[%c0_51, %c0_52, %c0_53], %86 {strides = array<i32>} : memref<1x1x128xf32, #tpu.memory_space<vmem>>, vector<1x1x128xf32>,
    } else {
    }
    %cst = arith.constant 0.000000e+00 : f32
    %5 = vector.broadcast %cst : f32 to vector<1x128xf32>
    %c0 = arith.constant 0 : index
    %c0_1 = arith.constant 0 : index
    %c0_2 = arith.constant 0 : index
    %6 = vector.load %arg4[%c0, %c0_1, %c0_2] : memref<1x8x128xi32, #tpu.memory_space<vmem>>, vector<1x8x128xi32>
    %7 = vector.shape_cast %6 : vector<1x8x128xi32> to vector<8x128xi32>
    %c0_3 = arith.constant 0 : index
    %c0_4 = arith.constant 0 : index
    %c0_5 = arith.constant 0 : index
    %c0_6 = arith.constant 0 : index
    %8 = vector.load %arg3[%c0_3, %c0_4, %c0_5, %c0_6] : memref<1x4x8x128xf32, #tpu.memory_space<vmem>>, vector<1x1x8x128xf32>
    %9 = vector.shape_cast %8 : vector<1x1x8x128xf32> to vector<8x128xf32>
    %c0_7 = arith.constant 0 : index
    %c1 = arith.constant 1 : index
    %c0_8 = arith.constant 0 : index
    %c0_9 = arith.constant 0 : index
    %10 = vector.load %arg3[%c0_7, %c1, %c0_8, %c0_9] : memref<1x4x8x128xf32, #tpu.memory_space<vmem>>, vector<1x1x8x128xf32>
    %11 = vector.shape_cast %10 : vector<1x1x8x128xf32> to vector<8x128xf32>
    %12 = arith.maximumf %9, %11 : vector<8x128xf32>
    %c0_10 = arith.constant 0 : index
    %c2 = arith.constant 2 : index
    %c0_11 = arith.constant 0 : index
    %c0_12 = arith.constant 0 : index
    %13 = vector.load %arg3[%c0_10, %c2, %c0_11, %c0_12] : memref<1x4x8x128xf32, #tpu.memory_space<vmem>>, vector<1x1x8x128xf32>
    %14 = vector.shape_cast %13 : vector<1x1x8x128xf32> to vector<8x128xf32>
    %15 = arith.maximumf %12, %14 : vector<8x128xf32>
    %c0_13 = arith.constant 0 : index
    %c3 = arith.constant 3 : index
    %c0_14 = arith.constant 0 : index
    %c0_15 = arith.constant 0 : index
    %16 = vector.load %arg3[%c0_13, %c3, %c0_14, %c0_15] : memref<1x4x8x128xf32, #tpu.memory_space<vmem>>, vector<1x1x8x128xf32>
    %17 = vector.shape_cast %16 : vector<1x1x8x128xf32> to vector<8x128xf32>
    %18 = arith.maximumf %15, %17 : vector<8x128xf32>
    %cst_16 = arith.constant 0.000000e+00 : f32
    %19 = vector.broadcast %cst_16 : f32 to vector<8x128xf32>
    %cst_17 = arith.constant 0.000000e+00 : f32
    %20 = vector.broadcast %cst_17 : f32 to vector<8x128xf32>
    %c0_i32_18 = arith.constant 0 : i32
    %21 = vector.broadcast %c0_i32_18 : i32 to vector<8x128xi32>
    %22 = arith.cmpi eq, %7, %21 : vector<8x128xi32>
    %c0_19 = arith.constant 0 : index
    %c0_20 = arith.constant 0 : index
    %c0_21 = arith.constant 0 : index
    %c0_22 = arith.constant 0 : index
    %23 = vector.load %arg3[%c0_19, %c0_20, %c0_21, %c0_22] : memref<1x4x8x128xf32, #tpu.memory_space<vmem>>, vector<1x1x8x128xf32>
    %24 = vector.shape_cast %23 : vector<1x1x8x128xf32> to vector<8x128xf32>
    %25 = arith.subf %24, %18 : vector<8x128xf32>
    %26 = math.exp %25 : vector<8x128xf32>
    %27 = arith.addf %19, %26 : vector<8x128xf32>
    %cst_23 = arith.constant 0.000000e+00 : f32
    %28 = vector.broadcast %cst_23 : f32 to vector<8x128xf32>
    %29 = arith.select %22, %24, %28 : vector<8x128xi1>, vector<8x128xf32>
    %30 = arith.addf %20, %29 : vector<8x128xf32>
    %c1_i32_24 = arith.constant 1 : i32
    %31 = vector.broadcast %c1_i32_24 : i32 to vector<8x128xi32>
    %32 = arith.cmpi eq, %7, %31 : vector<8x128xi32>
    %c0_25 = arith.constant 0 : index
    %c1_26 = arith.constant 1 : index
    %c0_27 = arith.constant 0 : index
    %c0_28 = arith.constant 0 : index
    %33 = vector.load %arg3[%c0_25, %c1_26, %c0_27, %c0_28] : memref<1x4x8x128xf32, #tpu.memory_space<vmem>>, vector<1x1x8x128xf32>
    %34 = vector.shape_cast %33 : vector<1x1x8x128xf32> to vector<8x128xf32>
    %35 = arith.subf %34, %18 : vector<8x128xf32>
    %36 = math.exp %35 : vector<8x128xf32>
    %37 = arith.addf %27, %36 : vector<8x128xf32>
    %cst_29 = arith.constant 0.000000e+00 : f32
    %38 = vector.broadcast %cst_29 : f32 to vector<8x128xf32>
    %39 = arith.select %32, %34, %38 : vector<8x128xi1>, vector<8x128xf32>
    %40 = arith.addf %30, %39 : vector<8x128xf32>
    %c2_i32 = arith.constant 2 : i32
    %41 = vector.broadcast %c2_i32 : i32 to vector<8x128xi32>
    %42 = arith.cmpi eq, %7, %41 : vector<8x128xi32>
    %c0_30 = arith.constant 0 : index
    %c2_31 = arith.constant 2 : index
    %c0_32 = arith.constant 0 : index
    %c0_33 = arith.constant 0 : index
    %43 = vector.load %arg3[%c0_30, %c2_31, %c0_32, %c0_33] : memref<1x4x8x128xf32, #tpu.memory_space<vmem>>, vector<1x1x8x128xf32>
    %44 = vector.shape_cast %43 : vector<1x1x8x128xf32> to vector<8x128xf32>
    %45 = arith.subf %44, %18 : vector<8x128xf32>
    %46 = math.exp %45 : vector<8x128xf32>
    %47 = arith.addf %37, %46 : vector<8x128xf32>
    %cst_34 = arith.constant 0.000000e+00 : f32
    %48 = vector.broadcast %cst_34 : f32 to vector<8x128xf32>
    %49 = arith.select %42, %44, %48 : vector<8x128xi1>, vector<8x128xf32>
    %50 = arith.addf %40, %49 : vector<8x128xf32>
    %c3_i32 = arith.constant 3 : i32
    %51 = vector.broadcast %c3_i32 : i32 to vector<8x128xi32>
    %52 = arith.cmpi eq, %7, %51 : vector<8x128xi32>
    %c0_35 = arith.constant 0 : index
    %c3_36 = arith.constant 3 : index
    %c0_37 = arith.constant 0 : index
    %c0_38 = arith.constant 0 : index
    %53 = vector.load %arg3[%c0_35, %c3_36, %c0_37, %c0_38] : memref<1x4x8x128xf32, #tpu.memory_space<vmem>>, vector<1x1x8x128xf32>
    %54 = vector.shape_cast %53 : vector<1x1x8x128xf32> to vector<8x128xf32>
    %55 = arith.subf %54, %18 : vector<8x128xf32>
    %56 = math.exp %55 : vector<8x128xf32>
    %57 = arith.addf %47, %56 : vector<8x128xf32>
    %cst_39 = arith.constant 0.000000e+00 : f32
    %58 = vector.broadcast %cst_39 : f32 to vector<8x128xf32>
    %59 = arith.select %52, %54, %58 : vector<8x128xi1>, vector<8x128xf32>
    %60 = arith.addf %50, %59 : vector<8x128xf32>
    %cst_40 = arith.constant 0.000000e+00 : f32
    %61 = vector.broadcast %cst_40 : f32 to vector<8x128xf32>
    %62 = arith.subf %61, %60 : vector<8x128xf32>
    %63 = arith.addf %62, %18 : vector<8x128xf32>
    %64 = math.log %57 : vector<8x128xf32>
    %65 = arith.addf %63, %64 : vector<8x128xf32>
    %66 = tpu.iota {dimensions = array<i32: 0>} : vector<8x128xi32>
    %67 = tpu.iota {dimensions = array<i32: 1>} : vector<8x128xi32>
    %c8_i32 = arith.constant 8 : i32
    %68 = arith.muli %1, %c8_i32 : i32
    %c0_i32_41 = arith.constant 0 : i32
    %69 = arith.addi %68, %c0_i32_41 : i32
    %70 = vector.broadcast %69 : i32 to vector<8x128xi32>
    %71 = arith.addi %70, %66 : vector<8x128xi32>
    %c128_i32 = arith.constant 128 : i32
    %72 = vector.broadcast %c128_i32 : i32 to vector<8x128xi32>
    %73 = arith.muli %71, %72 : vector<8x128xi32>
    %74 = arith.addi %73, %67 : vector<8x128xi32>
    %c256_i32 = arith.constant 256 : i32
    %75 = vector.broadcast %c256_i32 : i32 to vector<8x128xi32>
    %76 = arith.cmpi slt, %74, %75 : vector<8x128xi32>
    %cst_42 = arith.constant 0.000000e+00 : f32
    %77 = vector.broadcast %cst_42 : f32 to vector<8x128xf32>
    %78 = arith.select %76, %65, %77 : vector<8x128xi1>, vector<8x128xf32>
    %cst_43 = arith.constant dense<0.000000e+00> : vector<128xf32>
    %79 = vector.multi_reduction <add>, %78, %cst_43 [0] : vector<8x128xf32> to vector<128xf32>
    %80 = vector.shape_cast %79 : vector<128xf32> to vector<1x128xf32>
    %81 = arith.addf %5, %80 : vector<1x128xf32>
    %c0_44 = arith.constant 0 : index
    %c0_45 = arith.constant 0 : index
    %c0_46 = arith.constant 0 : index
    %82 = vector.load %arg5[%c0_44, %c0_45, %c0_46] : memref<1x1x128xf32, #tpu.memory_space<vmem>>, vector<1x1x128xf32>
    %83 = vector.shape_cast %81 : vector<1x128xf32> to vector<1x1x128xf32>
    %84 = arith.addf %82, %83 : vector<1x1x128xf32>
    %c0_47 = arith.constant 0 : index
    %c0_48 = arith.constant 0 : index
    %c0_49 = arith.constant 0 : index
    %85 = vector.load %arg5[%c0_47, %c0_48, %c0_49] : memref<1x1x128xf32, #tpu.memory_space<vmem>>, vector<1x1x128xf32>
    tpu.vector_store %arg5[%c0_47, %c0_48, %c0_49], %84 {strides = array<i32>} : memref<1x1x128xf32, #tpu.memory_space<vmem>>, vector<1x1x128xf32>,
    return
  }
  func.func @transform_0(%arg0: i32, %arg1: i32, %arg2: i32) -> (i32, i32, i32, i32) {
    %c1_i32 = arith.constant 1 : i32
    %0 = arith.muli %arg1, %c1_i32 : i32
    %1 = arith.addi %0, %arg2 : i32
    %c0_i32 = arith.constant 0 : i32
    %c0_i32_0 = arith.constant 0 : i32
    %c0_i32_1 = arith.constant 0 : i32
    return %arg0, %c0_i32, %1, %c0_i32_0 : i32, i32, i32, i32
  }
  func.func @transform_1(%arg0: i32, %arg1: i32, %arg2: i32) -> (i32, i32, i32) {
    %c1_i32 = arith.constant 1 : i32
    %0 = arith.muli %arg1, %c1_i32 : i32
    %1 = arith.addi %0, %arg2 : i32
    %c0_i32 = arith.constant 0 : i32
    %c0_i32_0 = arith.constant 0 : i32
    return %arg0, %1, %c0_i32 : i32, i32, i32
  }
  func.func @transform_2(%arg0: i32, %arg1: i32, %arg2: i32) -> (i32, i32, i32) {
    %c1_i32 = arith.constant 1 : i32
    %0 = arith.muli %arg0, %c1_i32 : i32
    %1 = arith.addi %0, %arg1 : i32
    %c0_i32 = arith.constant 0 : i32
    %c0_i32_0 = arith.constant 0 : i32
    %c0_i32_1 = arith.constant 0 : i32
    return %1, %c0_i32, %c0_i32_0 : i32, i32, i32
  }
}

</mosaic_0001>

<bundles_post_ra>
// kernel: tpu_custom_call.1
= control target key start
LH: loop header
LB: loop body
LE: loop exit
PB: predicated region body
PF: predicated region fallthrough
CT: control target
= control target key end

     0   :  { %7 = vsyncpa [#allocation3], 0  ;;  %s915_s0 = inlined_call_operand.hbm [shape: f32[2,4,8,128], index: 0, kind: input, shape index: {}]   ;;  %s916_s1 = inlined_call_operand.hbm [shape: s32[2,8,128], index: 1, kind: input, shape index: {}]   ;;  %s917_s2 = inlined_call_operand.hbm [shape: f32[2,1,128], index: 2, kind: output, shape index: {}]  }
   0x1   :  { %9 = vsyncpa [#allocation3 + $0x1], 0 }
   0x2   :  { %10 = vsyncpa [#allocation6], 0 }
   0x3   :  { %12 = vsyncpa [#allocation6 + $0x1], 0 }
   0x4   :  { %13 = vsyncpa [#allocation4], 0 }
   0x5   :  { %15 = vsyncpa [#allocation4 + $0x1], 0  ;;  %s693_s9 = smov 0   ;;  %s695_s10 = smov 0  }
   0x6   :  { %s697_s11 = smov 0   ;;  %s699_s12 = smov 0  }
   0x7   :  { %s701_s13 = smov 0   ;;  %s703_s14 = smov 0  }
   0x8 LB: > { %s425_s15 = sadd.s32 4294967295, %s670_s14   ;;  %s426_s16 = sadd.s32 4294967294, %s670_s14   ;;  %s670_s14 = sphi %s703_s14, %s21_s14   ;;  %s666_s13 = sphi %s701_s13, %s936_s13   ;;  %s662_s12 = sphi %s699_s12, %s935_s12   ;;  %s658_s11 = sphi %s697_s11, %s934_s11   ;;  %s654_s10 = sphi %s695_s10, %s933_s10   ;;  %s650_s9 = sphi %s693_s9, %s932_s9  }
   0x9   : > { %s40_s17 = sadd.s32 1, %s666_s13  ;;  %s51_s18 = sadd.s32 1, %s658_s11 }
   0xa   : > { %p42_p0 = scmp.ge.s32.totalorder %s40_s17, 2  ;;  %p58_p1 = scmp.ne.s32.totalorder %s658_s11, %s654_s10 }
   0xb   : > { %p59_p2 = scmp.eq.s32.totalorder %s670_s14, 0  ;;  %p64_p3 = scmp.ne.s32.totalorder %s654_s10, %s650_s9 }
   0xc   : > { %s938_s17 = smov (%p42_p0, %s40_s17), 0  ;;  %p65_p5 = scmp.eq.s32.totalorder %s425_s15, 0 }
   0xd   : > { %p734_p4 = por %p59_p2, %p58_p1  ;;  %s46_s20 = ssub.s32 %s666_s13, %s938_s17 }
   0xe   : > { %p120_p6 = scmp.eq.s32.totalorder %s425_s15, 1  ;;  %p49_p7 = scmp.eq.s32.totalorder %s46_s20, 0 }
   0xf   : > { %p740_p8 = por %p65_p5, %p64_p3  ;;  %p126_p10 = scmp.eq.s32.totalorder %s426_s16, 1 }
  0x10   : > { %p744_p9 = por %p120_p6, %p58_p1  ;;  %p461_p13 = scmp.lt.s32.totalorder %s670_s14, 2 }
  0x11   : > { %s921_s21 = scalar_select %p740_p8, 1, 0 }
  0x12   : > { %s922_s22 = scalar_select %p744_p9, 1, 0 }
  0x13   : > { %s749_s23 = scalar_select %p49_p7, %s658_s11, %s51_s18  }
  0x14   : > { %p751_p11 = por %p126_p10, %p64_p3  ;;  %s758_s25 = sand.u32 1, %s658_s11  }
  0x15   : > { %s429_s26 = sshll.u32 %s758_s25, 5  ;;  %s443_s27 = sshll.u32 %s666_s13, 9 }
  0x16   : > { %s923_s24 = scalar_select %p751_p11, 1, 0 }
  0x17   : > { %s765_s30 = scalar_lea.hbm %s915_s0, %s443_s27  ;;  %s150_s3 = scalar_lea.vmem [#allocation2], %s429_s26 }
  0x18   : > { %s159_s4 = sshll.u32 %s150_s3, 4  ;;  %p771_p0 = pnand %p461_p13, %p734_p4  ;;  %s767_s4 = int_to_ptr.vmem [resolvable:$true] %s159_s4 }
  0x19   : > { %s147_s6 = scalar_lea.sflag [#allocation3], %s758_s25  ;;  %s524_s7 = scalar_lea.hbm %s765_s30, 512 }
  0x1a   : > { %p525_p2 = scmp.ne.s32.totalorder %s765_s30, %s524_s7  ;;  %p526_p3 = pneg %p771_p0 }
  0x1b   : > { %s529_s16 = scalar_lea.hbm %s915_s0, 1024  ;;  %p530_p4 = scmp.lt.u32.totalorder %s765_s30, %s915_s0 }
  0x1c   : > { %p527_p5 = pnand %p526_p3, %p525_p2  ;;  %p531_p7 = scmp.lt.u32.totalorder %s529_s16, %s524_s7 }
  0x1d   : > { %p533_p13 = scmp.lt.u32.totalorder %s524_s7, %s765_s30 }
  0x1e   : > { %p528_p6 = pneg %p527_p5  ;;  %p532_p10 = por %p531_p7, %p530_p4 }
  0x20   : > { %p534_p12 = por %p533_p13, %p532_p10 }
  0x22   : > { %p535_p1 = pnand %p534_p12, %p528_p6 }
  0x24   : > { %538 = shalt.err (!%p535_p1)
}
  0x25   : > { %s539_s20 = scalar_lea.vmem %s767_s4, 512  ;;  %s672_s26 = smov [#allocation2]  }
  0x26   : > { %p540_p2 = scmp.ne.s32.totalorder %s767_s4, %s539_s20  ;;  %s544_s27 = sshll.u32 %s672_s26, 4  ;;  %s545_s27 = int_to_ptr.vmem [resolvable:$false] %s544_s27 }
  0x27   : > { %s546_s28 = scalar_lea.vmem %s545_s27, 1024  ;;  %p547_p9 = scmp.lt.s32.totalorder %s767_s4, %s545_s27 }
  0x28   : > { %p542_p5 = pnand %p540_p2, %p526_p3  ;;  %p548_p4 = scmp.lt.s32.totalorder %s546_s28, %s539_s20 }
  0x2a   : > { %p543_p11 = pneg %p542_p5  ;;  %p549_p7 = por %p548_p4, %p547_p9 }
  0x2c   : > { %p550_p10 = pnand %p549_p7, %p543_p11 }
  0x2e   : > { %553 = shalt.err (!%p550_p10)
}
  0x2f   : > { %s673_s29 = smov 128   ;;  %s674_s3 = smov 8  }
  0x30   : > { %453 = dma.hbm_to_vmem [thread:$0]  (!%p771_p0), %s765_s30, 512, %s767_s4, %s147_s6, %s673_s29, %s673_s29, %s674_s3  }
  0x31   : > { %p187_p12 = scmp.lt.s32.totalorder %s670_s14, 3  ;;  %s432_s7 = sshll.u32 %s758_s25, 3 }
  0x32   : > { %s433_s8 = sshll.u32 %s666_s13, 7  ;;  %p925_p9 = scmp.ge.s32.totalorder %s670_s14, 1 }
  0x33   : > { %s816_s19 = scalar_lea.hbm %s916_s1, %s433_s8  ;;  %s173_s20 = scalar_lea.vmem [#allocation5], %s432_s7 }
  0x34   : > { %p809_p11 = pnand %p925_p9, %p187_p12  ;;  %s182_s26 = sshll.u32 %s173_s20, 4  ;;  %s183_s26 = int_to_ptr.vmem [resolvable:$true] %s182_s26 }
  0x35   : > { %s170_s30 = scalar_lea.sflag [#allocation6], %s758_s25  ;;  %s554_s4 = scalar_lea.hbm %s816_s19, 128 }
  0x36   : > { %s926_s15 = scalar_select %p809_p11, 1, 0 }
  0x37   : > { %p555_p1 = scmp.ne.s32.totalorder %s816_s19, %s554_s4  ;;  %s559_s28 = scalar_lea.hbm %s916_s1, 256 }
  0x38   : > { %p560_p2 = scmp.lt.u32.totalorder %s816_s19, %s916_s1  ;;  %p561_p5 = scmp.lt.u32.totalorder %s559_s28, %s554_s4 }
  0x39   : > { %p557_p6 = pnand %p555_p1, %p526_p3  ;;  %p563_p7 = scmp.lt.u32.totalorder %s554_s4, %s816_s19 }
  0x3a   : > { %p562_p4 = por %p561_p5, %p560_p2 }
  0x3b   : > { %p558_p13 = pneg %p557_p6 }
  0x3c   : > { %p564_p10 = por %p563_p7, %p562_p4 }
  0x3e   : > { %p565_p12 = pnand %p564_p10, %p558_p13 }
  0x40   : > { %568 = shalt.err (!%p565_p12)
}
  0x41   : > { %s569_s25 = scalar_lea.vmem %s183_s26, 128  ;;  %s675_s7 = smov [#allocation5]  }
  0x42   : > { %p570_p9 = scmp.ne.s32.totalorder %s183_s26, %s569_s25  ;;  %s574_s8 = sshll.u32 %s675_s7, 4  ;;  %s575_s8 = int_to_ptr.vmem [resolvable:$false] %s574_s8 }
  0x43   : > { %s576_s16 = scalar_lea.vmem %s575_s8, 256  ;;  %p577_p8 = scmp.lt.s32.totalorder %s183_s26, %s575_s8 }
  0x44   : > { %p572_p1 = pnand %p570_p9, %p526_p3  ;;  %p578_p11 = scmp.lt.s32.totalorder %s576_s16, %s569_s25 }
  0x46   : > { %p573_p6 = pneg %p572_p1  ;;  %p579_p2 = por %p578_p11, %p577_p8 }
  0x48   : > { %p580_p5 = pnand %p579_p2, %p573_p6 }
  0x4a   : > { %583 = shalt.err (!%p580_p5)
}
  0x4b   : > { %456 = dma.hbm_to_vmem [thread:$0]  (!%p771_p0), %s816_s19, 128, %s183_s26, %s170_s30  }
  0x4c   : > { %p927_p13 = scmp.ne.s32.totalorder %s926_s15, 0 }
  0x4d   : > { %s841_s18 = sand.u32 (!%p927_p13), 1, %s654_s10   ;;  %p928_p3 = scmp.ne.s32.totalorder (!%p927_p13), %s921_s21, 0 }
  0x4e   : > { %191 = sbr.rel (%p927_p13) target bundleno = 162 (0xa2), region = 28  ;;  %s435_s20 = sshll.u32 (!%p927_p13), %s841_s18, 5 }
  0x4f   : > { %s194_s4 = scalar_lea.sflag (!%p927_p13), [#allocation3], %s841_s18  ;;  %s197_s6 = scalar_lea.vmem (!%p927_p13), [#allocation2], %s435_s20 }
  0x55   : > { %637 = dma.done.wait (%p928_p3), %s194_s4, 512  }
  0x56   : > { %639 = vsyncadd (%p928_p3), %s194_s4, 4294966784  ;;  %s436_s5 = sshll.u32 %s841_s18, 3  ;;  %s203_s15 = scalar_lea.sflag [#allocation6], %s841_s18 }
  0x57   : > { %s206_s19 = scalar_lea.vmem [#allocation5], %s436_s5 }
  0x58   : > { %641 = dma.done.wait (%p928_p3), %s203_s15, 128  }
  0x59   : > { %643 = vsyncadd (%p928_p3), %s203_s15, 4294967168  ;;  %s856_s26 = scalar_lea.vmem [#allocation7], %s841_s18  ;;  %v676_v0 = vmov 0.0   ;;  %v241_v1 = vld [vmem:[%s197_s6] sm:$0xff]  ;;  %v437_v2 = vld [vmem:[%s197_s6 + $0x8] sm:$0xff]  ;;  %v284_v27 = vlaneseq  ;;  %s440_s21 = sshll.u32 %s662_s12, 4 }
  0x5a   : > { %239 = vst [vmem:[%s856_s26] sm:$0x1] %v676_v0  ;;  %v244_v3 = vmax.f32 %v241_v1, %v437_v2  ;;  %v438_v4 = vld [vmem:[%s197_s6 + $0x10] sm:$0xff]  ;;  %v439_v5 = vld [vmem:[%s197_s6 + $0x18] sm:$0xff]  ;;  %v240_v16 = vld [vmem:[%s206_s19] sm:$0xff]  ;;  %s319_s30 = sshll.u32 %s856_s26, 4  ;;  %s865_s29 = scalar_lea.hbm %s917_s2, %s440_s21  ;;  %s867_s30 = int_to_ptr.vmem [resolvable:$true] %s319_s30 }
  0x5b   : > { %vm251_vm0 = vcmp.eq.s32.totalorder %v240_v16, 0  ;;  %vm258_vm1 = vcmp.eq.s32.totalorder %v240_v16, 1  ;;  %vm265_vm2 = vcmp.eq.s32.totalorder %v240_v16, 2  ;;  %vm272_vm3 = vcmp.eq.s32.totalorder %v240_v16, 3  ;;  %s306_s3 = scalar_lea.sflag [#allocation4], %s841_s18  ;;  %s584_s25 = scalar_lea.vmem %s867_s30, 16 }
  0x5c   : > { %v247_v6 = vmax.f32 %v244_v3, %v438_v4  ;;  %v256_v17 = vsel %vm251_vm0, %v241_v1, 0.0  ;;  %v263_v18 = vsel %vm258_vm1, %v437_v2, 0.0  ;;  %v270_v24 = vsel %vm265_vm2, %v438_v4, 0.0  ;;  %p585_p8 = scmp.ne.s32.totalorder %s867_s30, %s584_s25  ;;  %p929_p0 = scmp.ne.s32.totalorder %s922_s22, 0 }
  0x5d   : > { %v264_v21 = vadd.f32 %v263_v18, %v256_v17  ;;  %v277_v30 = vsel %vm272_vm3, %v439_v5, 0.0  ;;  %v285_v31 = vshrl.u32 %v284_v27, 7  ;;  %v287_v33 = vand.u32 127, %v284_v27  ;;  %s677_s12 = smov [#allocation7]  }
  0x5e   : > { %v250_v7 = vmax.f32 %v247_v6, %v439_v5  ;;  %p586_p11 = pnand %p585_p8, %p929_p0  ;;  %s588_s7 = sshll.u32 %s677_s12, 4  ;;  %s589_s7 = int_to_ptr.vmem [resolvable:$false] %s588_s7 }
  0x5f   : > { %v271_v28 = vadd.f32 %v270_v24, %v264_v21  ;;  %v291_v34 = vmul.u32 128, %v285_v31  ;;  %s590_s8 = scalar_lea.vmem %s589_s7, 32  ;;  %p591_p7 = scmp.lt.s32.totalorder %s867_s30, %s589_s7 }
  0x60   : > { %v252_v8 = vsub.f32 %v241_v1, %v250_v7  ;;  %v259_v9 = vsub.f32 %v437_v2, %v250_v7  ;;  %v266_v10 = vsub.f32 %v438_v4, %v250_v7  ;;  %v273_v11 = vsub.f32 %v439_v5, %v250_v7  ;;  %p587_p4 = pneg %p586_p11  ;;  %p592_p10 = scmp.lt.s32.totalorder %s590_s8, %s584_s25 }
  0x61   : > { %v278_v32 = vadd.f32 %v277_v30, %v271_v28  ;;  %v292_v36 = vadd.s32 %v291_v34, %v287_v33  ;;  %v302_v47 = vld [vmem:[%s856_s26] sm:$0x1] }
  0x62   : > { %v253_v12 = vmul.f32 1.442695, %v252_v8  ;;  %v260_v13 = vmul.f32 1.442695, %v259_v9  ;;  %v267_v14 = vmul.f32 1.442695, %v266_v10  ;;  %p593_p12 = por %p592_p10, %p591_p7 }
  0x63   : > { %v274_v15 = vmul.f32 1.442695, %v273_v11  ;;  %v279_v35 = vsub.f32 0.0, %v278_v32  ;;  %vm293_vm4 = vcmp.lt.s32.totalorder %v292_v36, 256 }
  0x64   : > { %514 = vpow2.f32 %v253_v12  ;;  %p594_p9 = pnand %p593_p12, %p587_p4 }
  0x65   : > { %516 = vpow2.f32 %v260_v13  ;;  %v280_v37 = vadd.f32 %v279_v35, %v250_v7 }
  0x66   : > { %518 = vpow2.f32 %v267_v14 }
  0x67   : > { %520 = vpow2.f32 %v274_v15 }
  0x6e   : > { %v515_v19 = vpop.eup %514 }
  0x6f   : > { %v517_v20 = vpop.eup %516 }
  0x70   : > { %v519_v22 = vpop.eup %518  ;;  %v262_v23 = vadd.f32 %v517_v20, %v515_v19 }
  0x71   : > { %v521_v25 = vpop.eup %520 }
  0x72   : > { %v269_v26 = vadd.f32 %v519_v22, %v262_v23 }
  0x74   : > { %v276_v29 = vadd.f32 %v521_v25, %v269_v26 }
  0x76   : > { %522 = vlog2.f32 %v276_v29 }
  0x80   : > { %v523_v38 = vpop.eup %522 }
  0x81   : > { %v282_v39 = vmul.f32 0.6931472, %v523_v38 }
  0x83   : > { %v283_v40 = vadd.f32 %v282_v39, %v280_v37 }
  0x85   : > { %v294_v41 = vsel %vm293_vm4, %v283_v40, 0.0 }
  0x86   : > { %v295_v42 = vrot.slane %v294_v41, 4 }
  0x88   : > { %v296_v43 = vadd.f32 %v295_v42, %v294_v41 }
  0x8a   : > { %v297_v44 = vrot.slane %v296_v43, 2 }
  0x8c   : > { %v298_v45 = vadd.f32 %v297_v44, %v296_v43 }
  0x8e   : > { %v299_v46 = vrot.slane %v298_v45, 1 }
  0x90   : > { %v300_v48 = vadd.f32 %v299_v46, %v298_v45 }
  0x92   : > { %v303_v49 = vadd.f32 %v302_v47, %v300_v48 }
  0x94   : > { %304 = vst [vmem:[%s856_s26] sm:$0x1] %v303_v49 }
  0x95   : > { %597 = shalt.err (!%p594_p9)
}
  0x96   : > { %s598_s16 = scalar_lea.hbm %s865_s29, 16  ;;  %s602_s4 = scalar_lea.hbm %s917_s2, 32 }
  0x97   : > { %p599_p1 = scmp.ne.s32.totalorder %s865_s29, %s598_s16  ;;  %p603_p5 = scmp.lt.u32.totalorder %s865_s29, %s917_s2 }
  0x98   : > { %p604_p13 = scmp.lt.u32.totalorder %s602_s4, %s598_s16  ;;  %p606_p8 = scmp.lt.u32.totalorder %s598_s16, %s865_s29 }
  0x99   : > { %p600_p6 = pnand %p599_p1, %p929_p0 }
  0x9a   : > { %p605_p3 = por %p604_p13, %p603_p5 }
  0x9b   : > { %p601_p2 = pneg %p600_p6 }
  0x9c   : > { %p607_p11 = por %p606_p8, %p605_p3 }
  0x9e   : > { %p608_p4 = pnand %p607_p11, %p601_p2 }
  0xa0   : > { %611 = shalt.err (!%p608_p4)
}
  0xa1   : > { %448 = dma.vmem_to_hbm [thread:$0]  (%p929_p0), %s867_s30, 16, %s865_s29, %s306_s3  }
  0xa2 PF: > { %s331_s15 = sand.u32 1, %s650_s9   ;;  %p930_p7 = scmp.ne.s32.totalorder %s923_s24, 0 }
  0xa3   : > { %p931_p10 = scmp.ge.s32.totalorder %s670_s14, 2  ;;  %s332_s19 = scalar_lea.sflag [#allocation4], %s331_s15 }
  0xa5   : > { %p458_p12 = pnand %p931_p10, %p930_p7 }
  0xa7   : > { %645 = dma.done.wait (!%p458_p12), %s332_s19, 16  }
  0xa8   : > { %647 = vsyncadd (!%p458_p12), %s332_s19, 4294967280  ;;  %s21_s14 = sadd.s32 1, %s670_s14   ;;  %s932_s9 = smov %s654_s10 }
  0xa9   : > { %p18_p9 = scmp.ge.s32.totalorder %s21_s14, 4   ;;  %s933_s10 = smov %s658_s11 }
  0xaa   : > { %s934_s11 = smov %s749_s23  ;;  %s935_s12 = smov %s666_s13 }
  0xab   : > { %s936_s13 = smov %s938_s17  ;;  %20 = sbr.rel (!%p18_p9) target bundleno = 8 (0x8), region = 93 }
  0xb2   :  { %336 = vsyncpa [#allocation3], 1 }
  0xb3   :  { %338 = vsyncpa [#allocation3 + $0x1], 1 }
  0xb4   :  { %339 = vsyncpa [#allocation6], 1 }
  0xb5   :  { %341 = vsyncpa [#allocation6 + $0x1], 1 }
  0xb6   :  { %342 = vsyncpa [#allocation4], 1 }
  0xb7   :  { %344 = vsyncpa [#allocation4 + $0x1], 1 }

</bundles_post_ra>
